<compile_context>
chip_gen: v6e
topology: v6e:2x2x1
jax: 0.10.0
libtpu: 0.0.40
codegen_flags: <defaults>
</compile_context>

<pallas_src>
import functools

import jax
import jax.numpy as jnp
from jax.experimental import pallas as pl
from jax.experimental.pallas import tpu as pltpu


def _focal_loss_kernel(x_ref, t_ref, *rest, gamma, use_alpha, hw, t_hw, need_mask):
    """One (1, C, t_hw) logits tile -> one (1, 1) partial loss sum.

    Layout: classes (C) on sublanes, spatial positions (t_hw) on lanes, so all
    128 lanes are busy regardless of C and loads/stores are lane-dense.
    """
    if use_alpha:
        a_ref, o_ref = rest
    else:
        a_ref = None
        (o_ref,) = rest

    x = x_ref[0].astype(jnp.float32)          # (C, t_hw) logits (f32 in-kernel)
    t = t_ref[0]                              # (1, t_hw) int32 class indices
    C = x.shape[0]

    # Numerically-stable log-softmax pieces over the class (sublane) axis.
    m = jnp.max(x, axis=0, keepdims=True)     # (1, t_hw)
    z = x - m                                 # (C, t_hw)
    lse = jnp.log(jnp.sum(jnp.exp(z), axis=0, keepdims=True))   # (1, t_hw)

    # Gather z at the target class with a where-mask (no f32 one-hot temp).
    cls = jax.lax.broadcasted_iota(jnp.int32, (C, t_hw), 0)
    sel = cls == t                            # (C, t_hw), t broadcasts on lanes
    z_t = jnp.sum(jnp.where(sel, z, 0.0), axis=0, keepdims=True)
    logpt = z_t - lse                         # (1, t_hw)
    pt = jnp.exp(logpt)                       # pt from UNscaled logpt (as in torch)

    if use_alpha:
        a = a_ref[...].astype(jnp.float32)    # (C, 1) per-class weights
        at = jnp.sum(jnp.where(sel, a, 0.0), axis=0, keepdims=True)
        logpt = logpt * at

    g = float(gamma)
    if g == 0.0:
        loss = -logpt
    else:
        omp = 1.0 - pt
        gi = int(round(g))
        if g == gi and 1 <= gi <= 4:
            # integer gamma -> plain VPU multiplies (no pow -> exp/log on EUP)
            focal = omp
            for _ in range(gi - 1):
                focal = focal * omp
        else:
            focal = omp ** g
        loss = -focal * logpt                 # (1, t_hw)

    if need_mask:
        # zero out contributions from padded spatial columns
        lane = jax.lax.broadcasted_iota(jnp.int32, (1, t_hw), 1)
        col = pl.program_id(1) * t_hw + lane
        loss = jnp.where(col < hw, loss, 0.0)

    # Per-tile partial sum; final reduction happens outside the kernel so the
    # grid stays fully parallel (no cross-step accumulator dependency).
    o_ref[0, 0] = jnp.sum(loss, axis=1, keepdims=True)   # (1, 1)


def _pick_t_hw(C, HW, itemsize):
    """Pick a lane-dense spatial tile: ~2 MB logits block, multiple of 128."""
    budget = 2 * 1024 * 1024
    t = budget // max(1, C * itemsize)
    t = max(512, min(int(t), 8192))
    t = (t // 128) * 128
    hw_up = ((HW + 127) // 128) * 128
    return max(128, min(t, hw_up))


def focal_loss_pallas(logits, target, *, gamma=0.0, alpha=None,
                      size_average=True, t_hw=None):
    """Focal loss matching round2/tagging/utils.py::FocalLoss.forward.

    logits: (N, C, H, W) / (N, C, L) float (class axis = dim 1), or (M, C)
    target: matching integer class indices ((N, H, W), (N, L), (M,), ...)
    alpha : None, a per-class weight vector of length C, or a scalar a
            (expanded to [a, 1-a] like the module; requires C == 2).
    """
    logits = jnp.asarray(logits)
    target = jnp.asarray(target)

    if logits.ndim > 2:
        N, C = logits.shape[0], logits.shape[1]
        HW = 1
        for d in logits.shape[2:]:
            HW *= d
        # Keep the class-major NCHW layout: reshape only (no HBM transpose pass).
        x3 = logits.reshape(N, C, HW)
    else:
        # Class-last 2-D input: one transpose so the long axis lands on lanes.
        M2, C = logits.shape
        N, HW = 1, M2
        x3 = jnp.transpose(logits)[None]                      # (1, C, M)
    t3 = target.reshape(N, 1, HW).astype(jnp.int32)
    M = N * HW

    use_alpha = alpha is not None
    if use_alpha:
        if isinstance(alpha, (float, int)):
            alpha = jnp.array([float(alpha), 1.0 - float(alpha)], dtype=jnp.float32)
        alpha = jnp.asarray(alpha, dtype=jnp.float32).reshape(-1)
        if alpha.shape[0] != C:
            # Do not silently zero-pad missing class weights (would drop loss
            # for those classes); mirror PyTorch's "valid use" contract.
            raise ValueError(f"alpha must have length C={C}, got {alpha.shape[0]}")
        a_col = alpha.reshape(C, 1)

    if t_hw is None:
        t_hw = _pick_t_hw(C, HW, x3.dtype.itemsize)
    t_hw = max(128, (int(t_hw) // 128) * 128)

    n_hw = -(-HW // t_hw)                     # cdiv
    HW_pad = n_hw * t_hw
    need_mask = HW_pad != HW
    if need_mask:
        pad = HW_pad - HW
        x3 = jnp.pad(x3, ((0, 0), (0, 0), (0, pad)))
        t3 = jnp.pad(t3, ((0, 0), (0, 0), (0, pad)))

    kernel = functools.partial(
        _focal_loss_kernel, gamma=float(gamma), use_alpha=use_alpha,
        hw=HW, t_hw=t_hw, need_mask=need_mask)

    in_specs = [
        pl.BlockSpec((1, C, t_hw), lambda n, j: (n, 0, j)),   # logits tile
        pl.BlockSpec((1, 1, t_hw), lambda n, j: (n, 0, j)),   # targets tile
    ]
    args = [x3, t3]
    if use_alpha:
        in_specs.append(pl.BlockSpec((C, 1), lambda n, j: (0, 0)))  # broadcast
        args.append(a_col)

    # Explicit VMEM budget (double-buffered inputs + f32 temporaries + slack),
    # capped well under v7x's 64 MiB physical VMEM.
    x_blk = C * t_hw * x3.dtype.itemsize
    vmem_need = 2 * (x_blk + t_hw * 4) + 12 * C * t_hw * 4 + (1 << 20)
    vmem_limit = int(min(48 * 1024 * 1024, max(16 * 1024 * 1024, vmem_need)))

    partials = pl.pallas_call(
        kernel,
        out_shape=jax.ShapeDtypeStruct((N, n_hw, 1, 1), jnp.float32),
        grid_spec=pltpu.PrefetchScalarGridSpec(
            num_scalar_prefetch=0,
            grid=(N, n_hw),
            in_specs=in_specs,
            out_specs=pl.BlockSpec((1, 1, 1, 1), lambda n, j: (n, j, 0, 0)),
        ),
        compiler_params=pltpu.CompilerParams(
            dimension_semantics=("parallel", "parallel"),
            vmem_limit_bytes=vmem_limit),
    )(*args)

    total = jnp.sum(partials)
    if size_average:
        return total / jnp.float32(M)
    return total


def _focal_loss_ref(logits, target, *, gamma=0.0, alpha=None, size_average=True):
    """Pure-JAX reference mirroring the PyTorch forward."""
    logits = jnp.asarray(logits)
    if logits.ndim > 2:
        N, C = logits.shape[0], logits.shape[1]
        x2d = jnp.transpose(logits.reshape(N, C, -1), (0, 2, 1)).reshape(-1, C)
    else:
        x2d = logits
        C = x2d.shape[1]
    t = target.reshape(-1).astype(jnp.int32)
    logp = jax.nn.log_softmax(x2d.astype(jnp.float32), axis=1)
    logpt = jnp.take_along_axis(logp, t[:, None], axis=1)[:, 0]
    pt = jnp.exp(logpt)
    if alpha is not None:
        if isinstance(alpha, (float, int)):
            alpha = jnp.array([alpha, 1.0 - alpha], dtype=jnp.float32)
        alpha = jnp.asarray(alpha, dtype=jnp.float32)
        logpt = logpt * alpha[t]
    loss = -1.0 * (1.0 - pt) ** gamma * logpt
    return loss.mean() if size_average else loss.sum()


if __name__ == "__main__":
    key = jax.random.PRNGKey(0)
    k1, k2, k3, k4, k5, k6 = jax.random.split(key, 6)

    # 1) NCHW path, per-class alpha, integer gamma.
    N, C, H, W = 2, 4, 16, 16
    logits = jax.random.normal(k1, (N, C, H, W), dtype=jnp.float32)
    target = jax.random.randint(k2, (N, H, W), 0, C, dtype=jnp.int32)
    alpha = [0.1, 0.2, 0.3, 0.4]
    out = jax.block_until_ready(
        focal_loss_pallas(logits, target, gamma=2.0, alpha=alpha, size_average=True))
    ref = _focal_loss_ref(logits, target, gamma=2.0, alpha=alpha, size_average=True)
    assert jnp.allclose(out, ref, rtol=1e-5, atol=1e-5), (out, ref)

    # 2) 2-D class-last path, default config (gamma=0, alpha=None).
    x2d = jnp.transpose(logits.reshape(N, C, -1), (0, 2, 1)).reshape(-1, C)
    out2 = jax.block_until_ready(
        focal_loss_pallas(x2d, target.reshape(-1), gamma=0.0, alpha=None))
    ref2 = _focal_loss_ref(logits, target, gamma=0.0, alpha=None)
    assert jnp.allclose(out2, ref2, rtol=1e-5, atol=1e-5), (out2, ref2)

    # 3) Ragged HW (padding + in-kernel mask), non-integer gamma, sum reduction.
    N3, C3, H3, W3 = 2, 3, 10, 10
    lg3 = jax.random.normal(k3, (N3, C3, H3, W3), dtype=jnp.float32)
    tg3 = jax.random.randint(k4, (N3, H3, W3), 0, C3, dtype=jnp.int32)
    out3 = jax.block_until_ready(
        focal_loss_pallas(lg3, tg3, gamma=1.5, alpha=None, size_average=False))
    ref3 = _focal_loss_ref(lg3, tg3, gamma=1.5, alpha=None, size_average=False)
    assert jnp.allclose(out3, ref3, rtol=1e-5, atol=1e-5), (out3, ref3)

    # 4) Scalar alpha -> [a, 1-a] (binary case), bf16 logits (read as bf16).
    N4, C4, H4, W4 = 1, 2, 8, 8
    lg4 = jax.random.normal(k5, (N4, C4, H4, W4), dtype=jnp.float32).astype(jnp.bfloat16)
    tg4 = jax.random.randint(k6, (N4, H4, W4), 0, C4, dtype=jnp.int32)
    out4 = jax.block_until_ready(
        focal_loss_pallas(lg4, tg4, gamma=2.0, alpha=0.25, size_average=True))
    ref4 = _focal_loss_ref(lg4, tg4, gamma=2.0, alpha=0.25, size_average=True)
    assert jnp.allclose(out4, ref4, rtol=1e-4, atol=1e-4), (out4, ref4)

    print("KERNEL_OK")
</pallas_src>

<mosaic_0001>
module attributes {stable_mosaic.version = 11 : i64} {
  func.func @_focal_loss_kernel(%arg0: i32, %arg1: i32, %arg2: memref<1x4x256xf32, #tpu.memory_space<vmem>>, %arg3: memref<1x1x256xi32, #tpu.memory_space<vmem>>, %arg4: memref<4x1xf32, #tpu.memory_space<vmem>>, %arg5: memref<1x1x1x1xf32, #tpu.memory_space<vmem>>) attributes {dimension_semantics = [#tpu.dimension_semantics<parallel>, #tpu.dimension_semantics<parallel>], iteration_bounds = array<i64: 2, 1>, scalar_prefetch = 0 : i64, scratch_operands = 0 : i64, tpu.core_type = #tpu.core_type<tc>, window_params = [{transform_indices = @transform_0, window_bounds = array<i64: 1, 4, 256>}, {transform_indices = @transform_1, window_bounds = array<i64: 1, 1, 256>}, {pipeline_mode = #tpu.pipeline_mode<synchronous>, transform_indices = @transform_2, window_bounds = array<i64: 4, 1>}, {transform_indices = @transform_3, window_bounds = array<i64: 1, 1, 1, 1>}]} {
    %c0 = arith.constant 0 : index
    %c0_0 = arith.constant 0 : index
    %c0_1 = arith.constant 0 : index
    %0 = vector.load %arg2[%c0, %c0_0, %c0_1] : memref<1x4x256xf32, #tpu.memory_space<vmem>>, vector<1x4x256xf32>
    %1 = vector.shape_cast %0 : vector<1x4x256xf32> to vector<4x256xf32>
    %c0_2 = arith.constant 0 : index
    %c0_3 = arith.constant 0 : index
    %c0_4 = arith.constant 0 : index
    %2 = vector.load %arg3[%c0_2, %c0_3, %c0_4] : memref<1x1x256xi32, #tpu.memory_space<vmem>>, vector<1x1x256xi32>
    %3 = vector.shape_cast %2 : vector<1x1x256xi32> to vector<1x256xi32>
    %cst = arith.constant dense<0xFF800000> : vector<256xf32>
    %4 = vector.multi_reduction <maximumf>, %1, %cst [0] : vector<4x256xf32> to vector<256xf32>
    %5 = vector.shape_cast %4 : vector<256xf32> to vector<1x256xf32>
    %6 = vector.broadcast %5 : vector<1x256xf32> to vector<4x256xf32>
    %7 = arith.subf %1, %6 : vector<4x256xf32>
    %8 = math.exp %7 : vector<4x256xf32>
    %cst_5 = arith.constant dense<0.000000e+00> : vector<256xf32>
    %9 = vector.multi_reduction <add>, %8, %cst_5 [0] : vector<4x256xf32> to vector<256xf32>
    %10 = vector.shape_cast %9 : vector<256xf32> to vector<1x256xf32>
    %11 = math.log %10 : vector<1x256xf32>
    %12 = tpu.iota {dimensions = array<i32: 0>} : vector<4x256xi32>
    %13 = vector.broadcast %3 : vector<1x256xi32> to vector<4x256xi32>
    %14 = arith.cmpi eq, %12, %13 : vector<4x256xi32>
    %cst_6 = arith.constant 0.000000e+00 : f32
    %15 = vector.broadcast %cst_6 : f32 to vector<4x256xf32>
    %16 = arith.select %14, %7, %15 : vector<4x256xi1>, vector<4x256xf32>
    %cst_7 = arith.constant dense<0.000000e+00> : vector<256xf32>
    %17 = vector.multi_reduction <add>, %16, %cst_7 [0] : vector<4x256xf32> to vector<256xf32>
    %18 = vector.shape_cast %17 : vector<256xf32> to vector<1x256xf32>
    %19 = arith.subf %18, %11 : vector<1x256xf32>
    %20 = math.exp %19 : vector<1x256xf32>
    %c0_8 = arith.constant 0 : index
    %c0_9 = arith.constant 0 : index
    %21 = vector.load %arg4[%c0_8, %c0_9] : memref<4x1xf32, #tpu.memory_space<vmem>>, vector<4x1xf32>
    %cst_10 = arith.constant 0.000000e+00 : f32
    %22 = vector.shape_cast %21 : vector<4x1xf32> to vector<4x1xf32>
    %23 = vector.broadcast %22 : vector<4x1xf32> to vector<4x256xf32>
    %24 = vector.broadcast %cst_10 : f32 to vector<4x256xf32>
    %25 = arith.select %14, %23, %24 : vector<4x256xi1>, vector<4x256xf32>
    %cst_11 = arith.constant dense<0.000000e+00> : vector<256xf32>
    %26 = vector.multi_reduction <add>, %25, %cst_11 [0] : vector<4x256xf32> to vector<256xf32>
    %27 = vector.shape_cast %26 : vector<256xf32> to vector<1x256xf32>
    %28 = arith.mulf %19, %27 : vector<1x256xf32>
    %cst_12 = arith.constant 1.000000e+00 : f32
    %29 = vector.broadcast %cst_12 : f32 to vector<1x256xf32>
    %30 = arith.subf %29, %20 : vector<1x256xf32>
    %31 = arith.mulf %30, %30 : vector<1x256xf32>
    %cst_13 = arith.constant 0.000000e+00 : f32
    %32 = vector.broadcast %cst_13 : f32 to vector<1x256xf32>
    %33 = arith.subf %32, %31 : vector<1x256xf32>
    %34 = arith.mulf %33, %28 : vector<1x256xf32>
    %cst_14 = arith.constant dense<0.000000e+00> : vector<1xf32>
    %35 = vector.multi_reduction <add>, %34, %cst_14 [1] : vector<1x256xf32> to vector<1xf32>
    %36 = vector.shape_cast %35 : vector<1xf32> to vector<1x1xf32>
    %c0_15 = arith.constant 0 : index
    %c0_16 = arith.constant 0 : index
    %c0_17 = arith.constant 0 : index
    %c0_18 = arith.constant 0 : index
    %37 = vector.load %arg5[%c0_15, %c0_16, %c0_17, %c0_18] : memref<1x1x1x1xf32, #tpu.memory_space<vmem>>, vector<1x1x1x1xf32>
    %38 = vector.shape_cast %37 : vector<1x1x1x1xf32> to vector<1x1xf32>
    %39 = vector.shape_cast %36 : vector<1x1xf32> to vector<1x1x1x1xf32>
    tpu.vector_store %arg5[%c0_15, %c0_16, %c0_17, %c0_18], %39 {strides = array<i32>} : memref<1x1x1x1xf32, #tpu.memory_space<vmem>>, vector<1x1x1x1xf32>,
    return
  }
  func.func @transform_0(%arg0: i32, %arg1: i32) -> (i32, i32, i32) {
    %c0_i32 = arith.constant 0 : i32
    %c0_i32_0 = arith.constant 0 : i32
    return %arg0, %c0_i32, %arg1 : i32, i32, i32
  }
  func.func @transform_1(%arg0: i32, %arg1: i32) -> (i32, i32, i32) {
    %c0_i32 = arith.constant 0 : i32
    %c0_i32_0 = arith.constant 0 : i32
    return %arg0, %c0_i32, %arg1 : i32, i32, i32
  }
  func.func @transform_2(%arg0: i32, %arg1: i32) -> (i32, i32) {
    %c0_i32 = arith.constant 0 : i32
    %c0_i32_0 = arith.constant 0 : i32
    %c0_i32_1 = arith.constant 0 : i32
    return %c0_i32, %c0_i32_0 : i32, i32
  }
  func.func @transform_3(%arg0: i32, %arg1: i32) -> (i32, i32, i32, i32) {
    %c0_i32 = arith.constant 0 : i32
    %c0_i32_0 = arith.constant 0 : i32
    %c0_i32_1 = arith.constant 0 : i32
    return %arg0, %arg1, %c0_i32, %c0_i32_0 : i32, i32, i32, i32
  }
}

</mosaic_0001>

<bundles_post_ra>
// kernel: tpu_custom_call.1
= control target key start
LH: loop header
LB: loop body
LE: loop exit
PB: predicated region body
PF: predicated region fallthrough
CT: control target
= control target key end

     0   :  { %8 = vsyncpa [#allocation3], 0  ;;  %s765_s0 = inlined_call_operand.hbm [shape: f32[2,4,256], index: 0, kind: input, shape index: {}]   ;;  %s766_s1 = inlined_call_operand.vmem [shape: s32[2,1,256], index: 1, kind: input, shape index: {}]   ;;  %s767_s2 = inlined_call_operand.vmem [shape: f32[4,1], index: 2, kind: input, shape index: {}]   ;;  %s768_s3 = inlined_call_operand.vmem [shape: f32[2,1,1,1], index: 3, kind: output, shape index: {}]  }
   0x1   :  { %10 = vsyncpa [#allocation3 + $0x1], 0  ;;  %s643_s12 = smov 0   ;;  %s645_s13 = smov 0  }
   0x2   :  { %s647_s14 = smov 0   ;;  %s649_s15 = smov 0  }
   0x3   :  { %s651_s16 = smov 0   ;;  %s653_s17 = smov 0  }
   0x4 LB: > { %s460_s18 = sadd.s32 4294967295, %s619_s17   ;;  %s28_s19 = sadd.s32 1, %s615_s16  ;;  %s619_s17 = sphi %s653_s17, %s16_s17   ;;  %s615_s16 = sphi %s651_s16, %s776_s16   ;;  %s611_s15 = sphi %s649_s15, %s775_s15   ;;  %s607_s14 = sphi %s647_s14, %s774_s14   ;;  %s603_s13 = sphi %s645_s13, %s773_s13   ;;  %s599_s12 = sphi %s643_s12, %s772_s12  }
   0x5   : > { %p30_p0 = scmp.ge.s32.totalorder %s28_s19, 2  ;;  %s37_s20 = sadd.s32 1, %s607_s14 }
   0x6   : > { %p44_p1 = scmp.ne.s32.totalorder %s607_s14, %s603_s13  ;;  %p45_p2 = scmp.eq.s32.totalorder %s619_s17, 0 }
   0x7   : > { %s778_s19 = smov (%p30_p0, %s28_s19), 0  ;;  %p50_p4 = scmp.ne.s32.totalorder %s603_s13, %s599_s12 }
   0x8   : > { %p679_p3 = por %p45_p2, %p44_p1  ;;  %s32_s22 = ssub.s32 %s615_s16, %s778_s19 }
   0x9   : > { %p51_p5 = scmp.eq.s32.totalorder %s460_s18, 0  ;;  %p35_p6 = scmp.eq.s32.totalorder %s32_s22, 0 }
   0xa   : > { %p479_p8 = scmp.lt.s32.totalorder %s619_s17, 2  ;;  %s154_s25 = sand.u32 1, %s607_s14  }
   0xb   : > { %p686_p7 = por %p51_p5, %p50_p4  ;;  %s472_s26 = sshll.u32 %s615_s16, 7 }
   0xc   : > { %s692_s24 = scalar_select %p35_p6, %s607_s14, %s37_s20  }
   0xd   : > { %s464_s27 = sshll.u32 %s154_s25, 3  ;;  %s166_s30 = scalar_lea.hbm %s765_s0, %s472_s26 }
   0xe   : > { %s158_s4 = scalar_lea.vmem [#allocation2], %s464_s27  ;;  %p701_p9 = pnand %p479_p8, %p679_p3 }
   0xf   : > { %s168_s5 = sshll.u32 %s158_s4, 4  ;;  %p467_p10 = scmp.ge.s32.totalorder %s619_s17, 1  ;;  %s169_s5 = int_to_ptr.vmem [resolvable:$true] %s168_s5 }
  0x10   : > { %p185_p11 = scmp.lt.s32.totalorder %s619_s17, 3  ;;  %s155_s7 = scalar_lea.sflag [#allocation3], %s154_s25 }
  0x11   : > { %p543_p12 = pneg %p701_p9  ;;  %s554_s8 = scalar_lea.vmem %s169_s5, 128 }
  0x12   : > { %p555_p13 = scmp.ne.s32.totalorder %s169_s5, %s554_s8  ;;  %s621_s9 = smov [#allocation2]  }
  0x13   : > { %s559_s10 = sshll.u32 %s621_s9, 4  ;;  %s560_s10 = int_to_ptr.vmem [resolvable:$false] %s559_s10 }
  0x14   : > { %p557_p0 = pnand %p555_p13, %p543_p12  ;;  %s561_s11 = scalar_lea.vmem %s560_s10, 256 }
  0x15   : > { %p562_p2 = scmp.lt.s32.totalorder %s169_s5, %s560_s10  ;;  %p563_p3 = scmp.lt.s32.totalorder %s561_s11, %s554_s8 }
  0x16   : > { %p558_p1 = pneg %p557_p0 }
  0x17   : > { %p564_p4 = por %p563_p3, %p562_p2 }
  0x19   : > { %p565_p5 = pnand %p564_p4, %p558_p1 }
  0x1b   : > { %568 = shalt.err (!%p565_p5)
}
  0x1c   : > { %478 = dma.hbm_to_vmem [thread:$0]  (!%p701_p9), %s166_s30, 128, %s169_s5, %s155_s7  }
  0x1d   : > { %p186_p6 = pnand %p467_p10, %p185_p11 }
  0x1e   : > { %s191_s12 = sand.u32 (!%p186_p6), 1, %s603_s13  }
  0x1f   : > { %189 = sbr.rel (%p186_p6) target bundleno = 322 (0x142), region = 32  ;;  %s468_s18 = sshll.u32 (!%p186_p6), %s191_s12, 3 }
  0x20   : > { %s192_s20 = scalar_lea.sflag (!%p186_p6), [#allocation3], %s191_s12  ;;  %s195_s21 = scalar_lea.vmem (!%p186_p6), [#allocation2], %s468_s18 }
  0x24   : > { %594 = dma.done.wait (%p686_p7), %s192_s20, 128  }
  0x25   : > { %596 = vsyncadd (%p686_p7), %s192_s20, 4294967168  ;;  %v622_v0 = vmov 0   ;;  %vm248_vm0 = vcmask 1043456   ;;  %v328_v1 = vld [vmem:[%s767_s2] sm:$0xf]  ;;  %p229_p7 = scmp.lt.s32.totalorder %s611_s15, 1  ;;  %v291_v23 = vlaneseq }
  0x26   : > { %529 = vset.pattern.permute.xlu0 %v622_v0  ;;  %v243_v2 = vld [vmem:[%s195_s21] sm:$0xff]  ;;  %vm363_vm3 = vcmask 0  }
  0x27   : > { %331 = vperm.xlu0 %529, %v328_v1   ;;  %v246_v3 = vcombine.high %v243_v2, %v243_v2  ;;  %v249_v4 = vsel %vm248_vm0, %v243_v2, -inf  ;;  %s780_s15 = smov (!%p229_p7, %s611_s15), 1  ;;  %v292_v26 = vshrl.u32 %v291_v23, 7 }
  0x28   : > { %v250_v5 = vrot.slane %v249_v4, 4  ;;  %s469_s23 = sshll.u32 %s780_s15, 1  ;;  %s242_s4 = scalar_lea.vmem %s768_s3, %s780_s15 }
  0x29   : > { %v256_v6 = vsel %vm248_vm0, %v246_v3, -inf  ;;  %s235_s28 = scalar_lea.vmem %s766_s1, %s469_s23  ;;  %v295_v29 = vsub.s32 0, %v292_v26  ;;  %v299_v30 = vsub.s32 1, %v292_v26 }
  0x2a   : > { %v257_v7 = vrot.slane %v256_v6, 4  ;;  %v251_v8 = vmax.f32 %v249_v4, %v250_v5  ;;  %v244_v31 = vld [vmem:[%s235_s28] sm:$0x3] }
  0x2b   : > { %v296_v34 = vrot.slane %v244_v31, %v295_v29  ;;  %v300_v35 = vrot.slane %v244_v31, %v299_v30 }
  0x2c   : > { %v258_v9 = vmax.f32 %v256_v6, %v257_v7  ;;  %v252_v10 = vrot.slane %v251_v8, 2 }
  0x2d   : > { %vm301_vm1 = vcmp.eq.s32.totalorder %v292_v26, %v296_v34  ;;  %vm302_vm2 = vcmp.eq.s32.totalorder %v292_v26, %v300_v35 }
  0x2e   : > { %v259_v11 = vrot.slane %v258_v9, 2  ;;  %v253_v12 = vmax.f32 %v251_v8, %v252_v10 }
  0x30   : > { %v260_v13 = vmax.f32 %v258_v9, %v259_v11  ;;  %v254_v14 = vrot.slane %v253_v12, 1 }
  0x32   : > { %v261_v15 = vrot.slane %v260_v13, 1  ;;  %v255_v16 = vmax.f32 %v253_v12, %v254_v14 }
  0x34   : > { %v262_v17 = vmax.f32 %v260_v13, %v261_v15 }
  0x36   : > { %v265_v18 = vcombine.low %v255_v16, %v262_v17 }
  0x38   : > { %v267_v19 = vsub.f32 %v243_v2, %v265_v18 }
  0x3a   : > { %v268_v20 = vmul.f32 1.442695, %v267_v19  ;;  %v304_v38 = vcombine.high %v267_v19, %v267_v19  ;;  %v306_v41 = vsel %vm301_vm1, %v267_v19, 0.0 }
  0x3b   : > { %v308_v44 = vsel %vm248_vm0, %v306_v41, 0.0 }
  0x3c   : > { %531 = vpow2.f32 %v268_v20  ;;  %v307_v42 = vsel %vm302_vm2, %v304_v38, 0.0  ;;  %v309_v47 = vrot.slane %v308_v44, 4 }
  0x3d   : > { %v315_v46 = vsel %vm248_vm0, %v307_v42, 0.0 }
  0x3e   : > { %v316_v49 = vrot.slane %v315_v46, 4  ;;  %v310_v51 = vadd.f32 %v309_v47, %v308_v44 }
  0x40   : > { %v317_v52 = vadd.f32 %v316_v49, %v315_v46  ;;  %v311_v53 = vrot.slane %v310_v51, 2 }
  0x42   : > { %v318_v54 = vrot.slane %v317_v52, 2  ;;  %v312_v55 = vadd.f32 %v311_v53, %v310_v51 }
  0x44   : > { %v319_v56 = vadd.f32 %v318_v54, %v317_v52  ;;  %v313_v57 = vrot.slane %v312_v55, 1 }
  0x46   : > { %v320_v59 = vrot.slane %v319_v56, 1  ;;  %v314_v62 = vadd.f32 %v313_v57, %v312_v55 }
  0x48   : > { %v321_v0 = vadd.f32 %v320_v59, %v319_v56 }
  0x49   : > { %v532_v21 = vpop.eup %531 }
  0x4a   : > { %v271_v22 = vcombine.high %v532_v21, %v532_v21  ;;  %v273_v24 = vsel %vm248_vm0, %v532_v21, 0.0 }
  0x4b   : > { %v274_v27 = vrot.slane %v273_v24, 4 }
  0x4c   : > { %v280_v25 = vsel %vm248_vm0, %v271_v22, 0.0 }
  0x4d   : > { %v281_v28 = vrot.slane %v280_v25, 4  ;;  %v275_v32 = vadd.f32 %v274_v27, %v273_v24 }
  0x4f   : > { %v282_v33 = vadd.f32 %v281_v28, %v280_v25  ;;  %v276_v36 = vrot.slane %v275_v32, 2 }
  0x51   : > { %v283_v37 = vrot.slane %v282_v33, 2  ;;  %v277_v39 = vadd.f32 %v276_v36, %v275_v32 }
  0x53   : > { %v284_v40 = vadd.f32 %v283_v37, %v282_v33  ;;  %v278_v43 = vrot.slane %v277_v39, 1 }
  0x55   : > { %v285_v45 = vrot.slane %v284_v40, 1  ;;  %v279_v48 = vadd.f32 %v278_v43, %v277_v39 }
  0x57   : > { %v286_v50 = vadd.f32 %v285_v45, %v284_v40  ;;  %533 = vlog2.f32 %v279_v48 }
  0x59   : > { %535 = vlog2.f32 %v286_v50 }
  0x64   : > { %v534_v58 = vpop.eup %533 }
  0x65   : > { %v288_v61 = vmul.f32 0.6931472, %v534_v58 }
  0x66   : > { %v536_v60 = vpop.eup %535 }
  0x67   : > { %v290_v63 = vmul.f32 0.6931472, %v536_v60  ;;  %v322_v1 = vsub.f32 %v314_v62, %v288_v61 }
  0x69   : > { %v323_v2 = vsub.f32 %v321_v0, %v290_v63  ;;  %v324_v3 = vmul.f32 1.442695, %v322_v1 }
  0x6b   : > { %v326_v4 = vmul.f32 1.442695, %v323_v2  ;;  %537 = vpow2.f32 %v324_v3 }
  0x6d   : > { %539 = vpow2.f32 %v326_v4 }
  0x78   : > { %v538_v6 = vpop.eup %537 }
  0x79   : > { %v352_v16 = vsub.f32 1.0, %v538_v6 }
  0x7a   : > { %v540_v9 = vpop.eup %539 }
  0x7b   : > { %v353_v17 = vsub.f32 1.0, %v540_v9  ;;  %v354_v22 = vmul.f32 %v352_v16, %v352_v16 }
  0x7d   : > { %v355_v23 = vmul.f32 %v353_v17, %v353_v17  ;;  %v356_v28 = vsub.f32 0.0, %v354_v22 }
  0x7f   : > { %v357_v29 = vsub.f32 0.0, %v355_v23 }
  0xa2   : > { %v332_v5 = vpop.permute.xlu0 %331 }
  0xa3   : > { %v334_v7 = vsel %vm301_vm1, %v332_v5, 0.0  ;;  %v335_v8 = vsel %vm302_vm2, %v332_v5, 0.0 }
  0xa4   : > { %v336_v10 = vsel %vm248_vm0, %v334_v7, 0.0  ;;  %v343_v11 = vsel %vm248_vm0, %v335_v8, 0.0 }
  0xa5   : > { %v337_v12 = vrot.slane %v336_v10, 4  ;;  %v344_v13 = vrot.slane %v343_v11, 4 }
  0xa7   : > { %v338_v14 = vadd.f32 %v337_v12, %v336_v10  ;;  %v345_v15 = vadd.f32 %v344_v13, %v343_v11 }
  0xa9   : > { %v339_v18 = vrot.slane %v338_v14, 2  ;;  %v346_v19 = vrot.slane %v345_v15, 2 }
  0xab   : > { %v340_v20 = vadd.f32 %v339_v18, %v338_v14  ;;  %v347_v21 = vadd.f32 %v346_v19, %v345_v15 }
  0xad   : > { %v341_v24 = vrot.slane %v340_v20, 1  ;;  %v348_v25 = vrot.slane %v347_v21, 1 }
  0xaf   : > { %v342_v26 = vadd.f32 %v341_v24, %v340_v20  ;;  %v349_v27 = vadd.f32 %v348_v25, %v347_v21 }
  0xb1   : > { %v350_v30 = vmul.f32 %v342_v26, %v322_v1  ;;  %v351_v31 = vmul.f32 %v349_v27, %v323_v2 }
  0xb3   : > { %v358_v32 = vmul.f32 %v356_v28, %v350_v30  ;;  %v359_v33 = vmul.f32 %v357_v29, %v351_v31 }
  0xb5   : > { %v360_v34 = vadd.f32 %v359_v33, %v358_v32 }
  0xb7   : > { %361 = vadd.xlane.f32.xlu0 %v360_v34 }
 0x140   : > { %v362_v35 = vpop.xlane.xlu0 %361 }
 0x141   : > { %364 = vst.msk [vmem:[%s242_s4] sm:$0x1] %vm363_vm3, %v362_v35 }
 0x142 PF: > { %s16_s17 = sadd.s32 1, %s619_s17   ;;  %s772_s12 = smov %s603_s13 }
 0x143   : > { %p13_p8 = scmp.ge.s32.totalorder %s16_s17, 4   ;;  %s773_s13 = smov %s607_s14 }
 0x144   : > { %s774_s14 = smov %s692_s24  ;;  %s775_s15 = smov %s615_s16 }
 0x145   : > { %s776_s16 = smov %s778_s19  ;;  %15 = sbr.rel (!%p13_p8) target bundleno = 4 (0x4), region = 75 }
 0x14a   :  { %388 = vsyncpa [#allocation3], 1 }
 0x14b   :  { %390 = vsyncpa [#allocation3 + $0x1], 1 }

</bundles_post_ra>
